<compile_context>
chip_gen: v7x
topology: tpu7x:2x2x1
jax: 0.10.0
libtpu: 0.0.40
codegen_flags: <defaults>
</compile_context>

<pallas_src>
import jax
import jax.numpy as jnp
from jax.experimental import pallas as pl
from jax.experimental.pallas import tpu as pltpu

_LANE = 128
_BLOCK_BYTES = 4 * 1024 * 1024        # 4 MiB per operand per block
_VMEM_LIMIT_BYTES = 32 * 1024 * 1024  # covers 2 ops x 2 bufs x 4 MiB + slack


def _hsigmoid_kernel(x_ref, o_ref):
    x = x_ref[...]
    # relu6(x + 3) / 6 == clamp(x + 3, 0, 6) * (1/6); stays in the input dtype
    # (bf16 in -> bf16 all the way -> half the HBM bytes moved).
    o_ref[...] = (jnp.clip(x + 3.0, 0.0, 6.0) * (1.0 / 6.0)).astype(o_ref.dtype)


def _sublane_pack(dtype):
    """Sublane packing multiple: 8 for 32-bit, 16 for bf16, 32 for int8/fp8."""
    return max(8, 32 // jnp.dtype(dtype).itemsize)


def _tensorcores_per_device():
    """Best-effort count of TensorCores one Pallas grid is sharded over.

    Returns 1 (safe default -> plain "parallel" semantics) when the hardware
    query does not expose a core count (v5e / v6e are single-core anyway).
    """
    try:
        info = pltpu.get_tpu_info()
        for name in ("num_cores", "core_count", "num_tensor_cores",
                     "tensorcore_count"):
            v = getattr(info, name, None)
            if isinstance(v, int) and v > 0:
                return v
    except Exception:
        pass
    try:
        v = getattr(jax.devices()[0], "num_cores", None)
        if isinstance(v, int) and v > 0:
            return v
    except Exception:
        pass
    return 1


def _choose_block_rows(m, dtype, max_rows, min_steps):
    """Sublane block size: as fat as allowed (mem-bound streaming), a multiple
    of the dtype's packing, and small enough to give `min_steps` grid steps
    when multiple TensorCores are available."""
    pack = _sublane_pack(dtype)
    if m <= pack:
        return m                                   # full-extent block: always legal
    bm = min(max_rows, m)
    if min_steps > 1:
        bm = min(bm, -(-m // min_steps))           # ceil(m / min_steps)
    return max(pack, (bm // pack) * pack)          # round down; never exceeds m


def _choose_block_elems(total, dtype, max_elems, min_steps):
    """1-D (flat) analogue of _choose_block_rows; block is a multiple of the
    (pack x 128) tile, ragged last block is masked by Pallas."""
    tile = _sublane_pack(dtype) * _LANE
    if total <= tile:
        return total                               # single full-extent block
    be = min(max_elems, total)
    if min_steps > 1:
        be = min(be, -(-total // min_steps))
    return max(tile, (be // tile) * tile)          # round down; never exceeds total


def hsigmoid(x, *, block_bytes=_BLOCK_BYTES, donate_input=False,
             core_parallel=None):
    """Apply h-sigmoid (relu6(x+3)/6) elementwise to an array of any shape."""
    orig_shape = x.shape
    dtype = x.dtype
    total = x.size
    if total == 0:
        return x

    itemsize = jnp.dtype(dtype).itemsize
    cores = _tensorcores_per_device()
    if core_parallel is None:
        core_parallel = cores > 1
    # >= 4 blocks per core keeps the double-buffer pipeline full on v7x;
    # on single-core chips don't force a split (per-step overhead only).
    min_steps = 4 * cores if cores > 1 else 1

    compiler_params = pltpu.CompilerParams(
        dimension_semantics=(pltpu.CORE_PARALLEL if core_parallel
                             else "parallel",),
        vmem_limit_bytes=_VMEM_LIMIT_BYTES,
    )
    io_alias = {0: 0} if donate_input else {}

    if total % _LANE == 0:
        # Common path: lane-dense (rows, 128) view; pure reshape, no copy.
        m = total // _LANE
        x2d = x.reshape(m, _LANE)
        max_rows = max(_sublane_pack(dtype), block_bytes // (_LANE * itemsize))
        bm = _choose_block_rows(m, dtype, max_rows, min_steps)
        out = pl.pallas_call(
            _hsigmoid_kernel,
            out_shape=jax.ShapeDtypeStruct((m, _LANE), dtype),
            grid=(pl.cdiv(m, bm),),
            in_specs=[pl.BlockSpec((bm, _LANE), lambda i: (i, 0))],
            out_specs=pl.BlockSpec((bm, _LANE), lambda i: (i, 0)),
            input_output_aliases=io_alias,
            compiler_params=compiler_params,
        )(x2d)
        return out.reshape(orig_shape)

    # Rare path (total % 128 != 0): run on the flat 1-D view directly and let
    # Pallas mask the ragged last block. No wrapper-side pad / un-pad passes.
    x1d = x.reshape(total)
    tile = _sublane_pack(dtype) * _LANE
    max_elems = max(tile, (block_bytes // itemsize // tile) * tile)
    be = _choose_block_elems(total, dtype, max_elems, min_steps)
    out = pl.pallas_call(
        _hsigmoid_kernel,
        out_shape=jax.ShapeDtypeStruct((total,), dtype),
        grid=(pl.cdiv(total, be),),
        in_specs=[pl.BlockSpec((be,), lambda i: (i,))],
        out_specs=pl.BlockSpec((be,), lambda i: (i,)),
        input_output_aliases=io_alias,
        compiler_params=compiler_params,
    )(x1d)
    return out.reshape(orig_shape)


if __name__ == "__main__":
    key = jax.random.PRNGKey(0)
    # NCHW input, small shape: batch=2, channels=4, spatial=16x16
    x = jax.random.normal(key, (2, 4, 16, 16), dtype=jnp.float32) * 4.0

    out = jax.block_until_ready(hsigmoid(x))
    ref = jnp.clip(x + 3.0, 0.0, 6.0) / 6.0
    assert out.shape == x.shape and out.dtype == x.dtype
    assert jnp.max(jnp.abs(out - ref)) < 1e-6

    # Exercise the rare non-multiple-of-128 (flat 1-D, no-pad) path too.
    x_odd = jax.random.normal(jax.random.PRNGKey(1), (3, 5, 7),
                              dtype=jnp.float32) * 4.0
    out_odd = jax.block_until_ready(hsigmoid(x_odd))
    ref_odd = jnp.clip(x_odd + 3.0, 0.0, 6.0) / 6.0
    assert out_odd.shape == x_odd.shape and out_odd.dtype == x_odd.dtype
    assert jnp.max(jnp.abs(out_odd - ref_odd)) < 1e-6

    print("KERNEL_OK")
</pallas_src>

<mosaic_0001>
module attributes {stable_mosaic.version = 11 : i64} {
  func.func @_hsigmoid_kernel(%arg0: i32, %arg1: memref<16x128xf32, #tpu.memory_space<vmem>>, %arg2: memref<16x128xf32, #tpu.memory_space<vmem>>) attributes {dimension_semantics = [#tpu.dimension_semantics<parallel>], iteration_bounds = array<i64: 1>, scalar_prefetch = 0 : i64, scratch_operands = 0 : i64, tpu.core_type = #tpu.core_type<tc>, window_params = [{transform_indices = @transform_0, window_bounds = array<i64: 16, 128>}, {transform_indices = @transform_1, window_bounds = array<i64: 16, 128>}]} {
    %c0 = arith.constant 0 : index
    %c0_0 = arith.constant 0 : index
    %0 = vector.load %arg1[%c0, %c0_0] : memref<16x128xf32, #tpu.memory_space<vmem>>, vector<16x128xf32>
    %cst = arith.constant 3.000000e+00 : f32
    %1 = vector.broadcast %cst : f32 to vector<16x128xf32>
    %2 = arith.addf %0, %1 : vector<16x128xf32>
    %cst_1 = arith.constant 0.000000e+00 : f32
    %cst_2 = arith.constant 6.000000e+00 : f32
    %3 = vector.broadcast %cst_1 : f32 to vector<16x128xf32>
    %4 = arith.maximumf %3, %2 : vector<16x128xf32>
    %5 = vector.broadcast %cst_2 : f32 to vector<16x128xf32>
    %6 = arith.minimumf %5, %4 : vector<16x128xf32>
    %cst_3 = arith.constant 0.166666672 : f32
    %7 = vector.broadcast %cst_3 : f32 to vector<16x128xf32>
    %8 = arith.mulf %6, %7 : vector<16x128xf32>
    %c0_4 = arith.constant 0 : index
    %c0_5 = arith.constant 0 : index
    %9 = vector.load %arg2[%c0_4, %c0_5] : memref<16x128xf32, #tpu.memory_space<vmem>>, vector<16x128xf32>
    tpu.vector_store %arg2[%c0_4, %c0_5], %8 {strides = array<i32>} : memref<16x128xf32, #tpu.memory_space<vmem>>, vector<16x128xf32>,
    return
  }
  func.func @transform_0(%arg0: i32) -> (i32, i32) {
    %c0_i32 = arith.constant 0 : i32
    %c0_i32_0 = arith.constant 0 : i32
    return %arg0, %c0_i32 : i32, i32
  }
  func.func @transform_1(%arg0: i32) -> (i32, i32) {
    %c0_i32 = arith.constant 0 : i32
    %c0_i32_0 = arith.constant 0 : i32
    return %arg0, %c0_i32 : i32, i32
  }
}

</mosaic_0001>

<bundles_post_ra>
// kernel: tpu_custom_call.1
= control target key start
LH: loop header
LB: loop body
LE: loop exit
PB: predicated region body
PF: predicated region fallthrough
CT: control target
= control target key end

     0   :  { %6 = vsyncpa [#allocation3], 0  ;;  %s148_s0 = inlined_call_operand.hbm [shape: f32[16,128], index: 0, kind: input, shape index: {}]   ;;  %s149_s1 = inlined_call_operand.hbm [shape: f32[16,128], index: 1, kind: output, shape index: {}]  }
   0x1   :  { %7 = vsyncpa [#allocation4], 0  ;;  %s104_s6 = smov [#allocation2]   ;;  %s56_s10 = scalar_lea.hbm %s148_s0, 256 }
   0x2   :  { %s13_s7 = sshll.u32 %s104_s6, 4  ;;  %p57_p0 = scmp.ne.s32.totalorder %s148_s0, %s56_s10  ;;  %s14_s7 = int_to_ptr.vmem [resolvable:$true] %s13_s7 }
   0x3   :  { %p60_p1 = scmp.lt.u32.totalorder %s56_s10, %s148_s0 }
   0x5   :  { %p62_p2 = pnand %p60_p1, %p57_p0 }
   0x7   :  { %65 = shalt.err (!%p62_p2)
}
   0x8   :  { %s66_s15 = scalar_lea.vmem %s14_s7, 256  ;;  %p71_p4 = scmp.lt.s32.totalorder %s14_s7, %s14_s7 }
   0x9   :  { %p67_p3 = scmp.ne.s32.totalorder %s14_s7, %s66_s15  ;;  %p72_p5 = scmp.lt.s32.totalorder %s66_s15, %s66_s15 }
   0xb   :  { %p73_p6 = por %p72_p5, %p71_p4 }
   0xd   :  { %p74_p7 = pnand %p73_p6, %p67_p3 }
   0xf   :  { %77 = shalt.err (!%p74_p7)
}
  0x10   :  { %s105_s16 = smov 128   ;;  %s106_s17 = smov 8  }
  0x11   :  { %19 = dma.hbm_to_vmem [thread:$0]  %s148_s0, 256, %s14_s7, [#allocation3], %s105_s16, %s105_s16, %s106_s17  }
  0x12   :  { %100 = dma.done.wait [#allocation3], 256  }
  0x13   :  { %101 = vsyncadd [#allocation3], 4294967040  ;;  %v23_v0 = vld [vmem:[#allocation2] sm:$0xff]  ;;  %v24_v1 = vld [vmem:[#allocation2 + $0x8] sm:$0xff]  ;;  %s107_s20 = smov [#allocation5]  }
  0x14   :  { %v25_v2 = vadd.f32 3.0, %v23_v0  ;;  %v26_v3 = vadd.f32 3.0, %v24_v1  ;;  %s40_s21 = sshll.u32 %s107_s20, 4  ;;  %s41_s21 = int_to_ptr.vmem [resolvable:$true] %s40_s21 }
  0x15   :  { %s78_s22 = scalar_lea.vmem %s41_s21, 256  ;;  %p83_p9 = scmp.lt.s32.totalorder %s41_s21, %s41_s21 }
  0x16   :  { %v27_v4 = vmax.f32 %v25_v2, 0.0  ;;  %v28_v5 = vmax.f32 %v26_v3, 0.0  ;;  %p79_p8 = scmp.ne.s32.totalorder %s41_s21, %s78_s22  ;;  %p84_p10 = scmp.lt.s32.totalorder %s78_s22, %s78_s22 }
  0x18   :  { %v29_v6 = vmin.f32 %v27_v4, 6.0  ;;  %v30_v7 = vmin.f32 %v28_v5, 6.0  ;;  %p85_p11 = por %p84_p10, %p83_p9 }
  0x1a   :  { %v31_v8 = vmul.f32 0.16666667, %v29_v6  ;;  %v32_v9 = vmul.f32 0.16666667, %v30_v7  ;;  %p86_p12 = pnand %p85_p11, %p79_p8 }
  0x1c   :  { %33 = vst [vmem:[#allocation5] sm:$0xff] %v31_v8  ;;  %34 = vst [vmem:[#allocation5 + $0x8] sm:$0xff] %v32_v9 }
  0x1d   :  { %89 = shalt.err (!%p86_p12)
}
  0x1e   :  { %s90_s24 = scalar_lea.hbm %s149_s1, 256 }
  0x1f   :  { %p91_p13 = scmp.ne.s32.totalorder %s149_s1, %s90_s24  ;;  %p94_p0 = scmp.lt.u32.totalorder %s90_s24, %s149_s1 }
  0x21   :  { %p96_p1 = pnand %p94_p0, %p91_p13 }
  0x23   :  { %99 = shalt.err (!%p96_p1)
}
  0x24   :  { %46 = dma.vmem_to_hbm [thread:$0]  %s41_s21, 256, %s149_s1, [#allocation4], %s105_s16, %s105_s16, %s106_s17  }
  0x25   :  { %102 = dma.done.wait [#allocation4], 256  }
  0x26   :  { %103 = vsyncadd [#allocation4], 4294967040 }
  0x27   :  { %50 = vsyncpa [#allocation3], 1 }
  0x28   :  { %51 = vsyncpa [#allocation4], 1 }

</bundles_post_ra>
